<compile_context>
chip_gen: v6e
topology: v6e:2x2x1
jax: 0.10.0
libtpu: 0.0.40
codegen_flags: <defaults>
</compile_context>

<pallas_src>
import functools
from math import exp

import numpy as np
import jax
import jax.numpy as jnp
from jax.experimental import pallas as pl
from jax.experimental.pallas import tpu as pltpu


# ----------------------------- parameter setup ------------------------------

def gaussian_1d(window_size: int, sigma: float) -> np.ndarray:
    g = np.array(
        [exp(-((x - window_size // 2) ** 2) / float(2 * sigma ** 2))
         for x in range(window_size)],
        dtype=np.float64,
    )
    return (g / g.sum()).astype(np.float32)


def band_matrix(size: int, g: np.ndarray, pad: int) -> np.ndarray:
    """M[i, p] = g[p - i + pad] (zero outside the window): a zero-padded
    'same' 1-D convolution expressed as a matmul.  Symmetric (Gaussian)."""
    ws = g.shape[0]
    m = np.zeros((size, size), dtype=np.float32)
    for i in range(size):
        for p in range(size):
            a = p - i + pad
            if 0 <= a < ws:
                m[i, p] = g[a]
    return m


# --------------------------------- kernel -----------------------------------

def ssl_kernel(kop_ref, yp_ref, yr_ref, out_ref, stack_ref, conv_ref, *,
               beta, gamma, eps):
    n, hw = yp_ref.shape          # (N, H*W) row-major flattened images
    C1 = 0.01

    yp = yp_ref[...]              # (N, HW) f32
    yr = yr_ref[...]              # (N, HW) f32

    # sigmoid via EUP exp + approx reciprocal (divide-free on the VPU)
    y = pl.reciprocal(1.0 + jnp.exp(-yp), approx=True) + eps
    # stable BCE-with-logits: log(1+exp(-x)) = max(-x,0) + log(1+exp(-|x|))
    ce = (yp - yr * yp + jnp.maximum(-yp, 0.0)
          + jnp.log(1.0 + jnp.exp(-jnp.abs(yp))))

    # Stack the 4 conv operands for all N images into one (4N, HW) operand.
    stack_ref[0:n, :] = y
    stack_ref[n:2 * n, :] = yr
    stack_ref[2 * n:3 * n, :] = y * y
    stack_ref[3 * n:4 * n, :] = yr * yr

    # All 4*N Gaussian 'same' convs as ONE bf16 MXU matmul, f32 accumulation:
    # kop = kron(A, B) is symmetric, so vec(A X B) = vec(X) @ kop.
    conv_ref[...] = jnp.dot(stack_ref[...].astype(jnp.bfloat16),
                            kop_ref[...],
                            preferred_element_type=jnp.float32)

    mu1 = conv_ref[0:n, :]
    mu2 = conv_ref[n:2 * n, :]
    sigma1_sq = conv_ref[2 * n:3 * n, :] - mu1 * mu1
    sigma2_sq = conv_ref[3 * n:4 * n, :] - mu2 * mu2

    inv1 = pl.reciprocal(jnp.sqrt(sigma1_sq + C1) + C1, approx=True)
    inv2 = pl.reciprocal(jnp.sqrt(sigma2_sq + C1) + C1, approx=True)
    e = jnp.abs((yr - mu1 + C1) * inv1 - (y - mu2 + C1) * inv2)

    # global reductions (single pass, no per-image loop)
    e_max = jnp.max(e)
    mask = jnp.where(e > beta * e_max, 1.0, 0.0)
    m_cnt = jnp.sum(mask)
    num = jnp.sum(mask * e * ce)
    ce_mean = jnp.sum(ce) * (1.0 / float(n * hw))

    m_safe = jnp.maximum(m_cnt, 1.0)      # guard: reference NaNs if mask empty
    loss = gamma * ce_mean + (1.0 - gamma) * (num / m_safe)
    out_ref[...] = jnp.broadcast_to(loss, out_ref.shape)


# -------------------------------- wrapper ------------------------------------

def ssl_loss_pallas(y_pred, y_real, window_size=11, beta=0.1, gamma=0.5,
                    eps=1e-6):
    N, C, H, W = y_pred.shape
    assert C == 1, "reference conv2d(groups=1, weight=(C,1,ws,ws)) needs C==1"
    HW = H * W
    yp = y_pred.reshape(N, HW).astype(jnp.float32)
    yr = y_real.reshape(N, HW).astype(jnp.float32)

    pad = window_size // 2
    g = gaussian_1d(window_size, 1.5)
    A = band_matrix(H, g, pad)                    # (H, H) row conv
    B = band_matrix(W, g, pad)                    # (W, W) col conv
    # Whole 2-D 'same' Gaussian conv as a single (HW, HW) operator (bf16 MXU
    # weights, f32 accumulation).  Only viable while HW is small; see TODO.
    kop = jnp.asarray(np.kron(A, B), dtype=jnp.bfloat16)

    kernel = functools.partial(ssl_kernel, beta=float(beta),
                               gamma=float(gamma), eps=float(eps))
    out = pl.pallas_call(
        kernel,
        out_shape=jax.ShapeDtypeStruct((1, 1), jnp.float32),
        in_specs=[pl.BlockSpec(memory_space=pltpu.MemorySpace.VMEM)] * 3,
        out_specs=pl.BlockSpec(memory_space=pltpu.MemorySpace.VMEM),
        scratch_shapes=[pltpu.VMEM((4 * N, HW), jnp.float32),   # stacked operands
                        pltpu.VMEM((4 * N, HW), jnp.float32)],  # conv results
        compiler_params=pltpu.CompilerParams(
            vmem_limit_bytes=32 * 1024 * 1024),
    )(kop, yp, yr)
    return out[0, 0]


# --------------------------- pure-JAX reference -------------------------------

def ssl_loss_reference(y_pred, y_real, window_size=11, beta=0.1, gamma=0.5,
                       eps=1e-6):
    g = jnp.asarray(gaussian_1d(window_size, 1.5))
    w2d = jnp.outer(g, g)[None, None]                      # (1,1,ws,ws)
    pad = window_size // 2

    def conv(x):
        return jax.lax.conv_general_dilated(
            x, w2d, (1, 1), [(pad, pad), (pad, pad)],
            dimension_numbers=("NCHW", "OIHW", "NCHW"))

    y = jax.nn.sigmoid(y_pred) + eps
    ce = y_pred - y_real * y_pred + jnp.log(1.0 + jnp.exp(-y_pred))
    mu1, mu2 = conv(y), conv(y_real)
    s1 = conv(y * y) - mu1 ** 2
    s2 = conv(y_real * y_real) - mu2 ** 2
    C1 = 0.01
    e = jnp.abs((y_real - mu1 + C1) / (jnp.sqrt(s1 + C1) + C1)
                - (y - mu2 + C1) / (jnp.sqrt(s2 + C1) + C1))
    e_max = jnp.max(e)
    mask = jnp.where(e > beta * e_max, 1.0, 0.0)
    M = jnp.sum(mask)
    ssl_v = jnp.sum(mask * e * ce) / M
    return gamma * jnp.mean(ce) + (1.0 - gamma) * ssl_v


# ---------------------------------- main --------------------------------------

if __name__ == "__main__":
    key = jax.random.PRNGKey(0)
    k1, k2 = jax.random.split(key)
    N, C, H, W = 2, 1, 16, 16
    y_pred = jax.random.normal(k1, (N, C, H, W), dtype=jnp.float32)
    y_real = jax.random.bernoulli(k2, 0.5, (N, C, H, W)).astype(jnp.float32)

    loss = ssl_loss_pallas(y_pred, y_real)
    loss = jax.block_until_ready(loss)

    ref = jax.block_until_ready(ssl_loss_reference(y_pred, y_real))
    # loose tolerance: bf16 MXU conv + approx EUP reciprocals vs f32 XLA conv
    np.testing.assert_allclose(np.asarray(loss), np.asarray(ref),
                               rtol=5e-2, atol=1e-3)

    print("KERNEL_OK")
</pallas_src>

<mosaic_0001>
module attributes {stable_mosaic.version = 11 : i64} {
  func.func @ssl_kernel(%arg0: memref<256x256xbf16, #tpu.memory_space<vmem>>, %arg1: memref<2x256xf32, #tpu.memory_space<vmem>>, %arg2: memref<2x256xf32, #tpu.memory_space<vmem>>, %arg3: memref<1x1xf32, #tpu.memory_space<vmem>>, %arg4: memref<8x256xf32, #tpu.memory_space<vmem>>, %arg5: memref<8x256xf32, #tpu.memory_space<vmem>>) attributes {dimension_semantics = [], scalar_prefetch = 0 : i64, scratch_operands = 2 : i64, tpu.core_type = #tpu.core_type<tc>} {
    %c0 = arith.constant 0 : index
    %c0_0 = arith.constant 0 : index
    %0 = vector.load %arg1[%c0, %c0_0] : memref<2x256xf32, #tpu.memory_space<vmem>>, vector<2x256xf32>
    %c0_1 = arith.constant 0 : index
    %c0_2 = arith.constant 0 : index
    %1 = vector.load %arg2[%c0_1, %c0_2] : memref<2x256xf32, #tpu.memory_space<vmem>>, vector<2x256xf32>
    %cst = arith.constant 0.000000e+00 : f32
    %2 = vector.broadcast %cst : f32 to vector<2x256xf32>
    %3 = arith.subf %2, %0 : vector<2x256xf32>
    %4 = math.exp %3 : vector<2x256xf32>
    %cst_3 = arith.constant 1.000000e+00 : f32
    %5 = vector.broadcast %cst_3 : f32 to vector<2x256xf32>
    %6 = arith.addf %5, %4 : vector<2x256xf32>
    %7 = tpu.reciprocal %6 {approx = true} : vector<2x256xf32> -> vector<2x256xf32>
    %cst_4 = arith.constant 9.99999997E-7 : f32
    %8 = vector.broadcast %cst_4 : f32 to vector<2x256xf32>
    %9 = arith.addf %7, %8 : vector<2x256xf32>
    %10 = arith.mulf %1, %0 : vector<2x256xf32>
    %11 = arith.subf %0, %10 : vector<2x256xf32>
    %cst_5 = arith.constant 0.000000e+00 : f32
    %12 = vector.broadcast %cst_5 : f32 to vector<2x256xf32>
    %13 = arith.subf %12, %0 : vector<2x256xf32>
    %cst_6 = arith.constant 0.000000e+00 : f32
    %14 = vector.broadcast %cst_6 : f32 to vector<2x256xf32>
    %15 = arith.maximumf %13, %14 : vector<2x256xf32>
    %16 = arith.addf %11, %15 : vector<2x256xf32>
    %17 = math.absf %0 : vector<2x256xf32>
    %cst_7 = arith.constant 0.000000e+00 : f32
    %18 = vector.broadcast %cst_7 : f32 to vector<2x256xf32>
    %19 = arith.subf %18, %17 : vector<2x256xf32>
    %20 = math.exp %19 : vector<2x256xf32>
    %cst_8 = arith.constant 1.000000e+00 : f32
    %21 = vector.broadcast %cst_8 : f32 to vector<2x256xf32>
    %22 = arith.addf %21, %20 : vector<2x256xf32>
    %23 = math.log %22 : vector<2x256xf32>
    %24 = arith.addf %16, %23 : vector<2x256xf32>
    %c0_9 = arith.constant 0 : index
    %c0_10 = arith.constant 0 : index
    %25 = vector.load %arg4[%c0_9, %c0_10] : memref<8x256xf32, #tpu.memory_space<vmem>>, vector<2x256xf32>
    tpu.vector_store %arg4[%c0_9, %c0_10], %9 {strides = array<i32>} : memref<8x256xf32, #tpu.memory_space<vmem>>, vector<2x256xf32>,
    %c2 = arith.constant 2 : index
    %c0_11 = arith.constant 0 : index
    %26 = vector.load %arg4[%c2, %c0_11] : memref<8x256xf32, #tpu.memory_space<vmem>>, vector<2x256xf32>
    tpu.vector_store %arg4[%c2, %c0_11], %1 {strides = array<i32>} : memref<8x256xf32, #tpu.memory_space<vmem>>, vector<2x256xf32>,
    %27 = arith.mulf %9, %9 : vector<2x256xf32>
    %c4 = arith.constant 4 : index
    %c0_12 = arith.constant 0 : index
    %28 = vector.load %arg4[%c4, %c0_12] : memref<8x256xf32, #tpu.memory_space<vmem>>, vector<2x256xf32>
    tpu.vector_store %arg4[%c4, %c0_12], %27 {strides = array<i32>} : memref<8x256xf32, #tpu.memory_space<vmem>>, vector<2x256xf32>,
    %29 = arith.mulf %1, %1 : vector<2x256xf32>
    %c6 = arith.constant 6 : index
    %c0_13 = arith.constant 0 : index
    %30 = vector.load %arg4[%c6, %c0_13] : memref<8x256xf32, #tpu.memory_space<vmem>>, vector<2x256xf32>
    tpu.vector_store %arg4[%c6, %c0_13], %29 {strides = array<i32>} : memref<8x256xf32, #tpu.memory_space<vmem>>, vector<2x256xf32>,
    %c0_14 = arith.constant 0 : index
    %c0_15 = arith.constant 0 : index
    %31 = vector.load %arg4[%c0_14, %c0_15] : memref<8x256xf32, #tpu.memory_space<vmem>>, vector<8x256xf32>
    %32 = arith.truncf %31 : vector<8x256xf32> to vector<8x256xbf16>
    %c0_16 = arith.constant 0 : index
    %c0_17 = arith.constant 0 : index
    %33 = vector.load %arg0[%c0_16, %c0_17] : memref<256x256xbf16, #tpu.memory_space<vmem>>, vector<256x256xbf16>
    %cst_18 = arith.constant dense<0.000000e+00> : vector<8x256xf32>
    %34 = tpu.matmul %32, %33, %cst_18 {dimension_numbers = #tpu.dot_dimension_numbers<[1], [0], [0], [1], [0, 0, 1, 1], [], []>} : vector<8x256xbf16>, vector<256x256xbf16>, vector<8x256xf32> -> vector<8x256xf32>
    %c0_19 = arith.constant 0 : index
    %c0_20 = arith.constant 0 : index
    %35 = vector.load %arg5[%c0_19, %c0_20] : memref<8x256xf32, #tpu.memory_space<vmem>>, vector<8x256xf32>
    tpu.vector_store %arg5[%c0_19, %c0_20], %34 {strides = array<i32>} : memref<8x256xf32, #tpu.memory_space<vmem>>, vector<8x256xf32>,
    %c0_21 = arith.constant 0 : index
    %c0_22 = arith.constant 0 : index
    %36 = vector.load %arg5[%c0_21, %c0_22] : memref<8x256xf32, #tpu.memory_space<vmem>>, vector<2x256xf32>
    %c2_23 = arith.constant 2 : index
    %c0_24 = arith.constant 0 : index
    %37 = vector.load %arg5[%c2_23, %c0_24] : memref<8x256xf32, #tpu.memory_space<vmem>>, vector<2x256xf32>
    %c4_25 = arith.constant 4 : index
    %c0_26 = arith.constant 0 : index
    %38 = vector.load %arg5[%c4_25, %c0_26] : memref<8x256xf32, #tpu.memory_space<vmem>>, vector<2x256xf32>
    %39 = arith.mulf %36, %36 : vector<2x256xf32>
    %40 = arith.subf %38, %39 : vector<2x256xf32>
    %c6_27 = arith.constant 6 : index
    %c0_28 = arith.constant 0 : index
    %41 = vector.load %arg5[%c6_27, %c0_28] : memref<8x256xf32, #tpu.memory_space<vmem>>, vector<2x256xf32>
    %42 = arith.mulf %37, %37 : vector<2x256xf32>
    %43 = arith.subf %41, %42 : vector<2x256xf32>
    %cst_29 = arith.constant 0.00999999977 : f32
    %44 = vector.broadcast %cst_29 : f32 to vector<2x256xf32>
    %45 = arith.addf %40, %44 : vector<2x256xf32>
    %46 = math.sqrt %45 : vector<2x256xf32>
    %cst_30 = arith.constant 0.00999999977 : f32
    %47 = vector.broadcast %cst_30 : f32 to vector<2x256xf32>
    %48 = arith.addf %46, %47 : vector<2x256xf32>
    %49 = tpu.reciprocal %48 {approx = true} : vector<2x256xf32> -> vector<2x256xf32>
    %cst_31 = arith.constant 0.00999999977 : f32
    %50 = vector.broadcast %cst_31 : f32 to vector<2x256xf32>
    %51 = arith.addf %43, %50 : vector<2x256xf32>
    %52 = math.sqrt %51 : vector<2x256xf32>
    %cst_32 = arith.constant 0.00999999977 : f32
    %53 = vector.broadcast %cst_32 : f32 to vector<2x256xf32>
    %54 = arith.addf %52, %53 : vector<2x256xf32>
    %55 = tpu.reciprocal %54 {approx = true} : vector<2x256xf32> -> vector<2x256xf32>
    %56 = arith.subf %1, %36 : vector<2x256xf32>
    %cst_33 = arith.constant 0.00999999977 : f32
    %57 = vector.broadcast %cst_33 : f32 to vector<2x256xf32>
    %58 = arith.addf %56, %57 : vector<2x256xf32>
    %59 = arith.mulf %58, %49 : vector<2x256xf32>
    %60 = arith.subf %9, %37 : vector<2x256xf32>
    %cst_34 = arith.constant 0.00999999977 : f32
    %61 = vector.broadcast %cst_34 : f32 to vector<2x256xf32>
    %62 = arith.addf %60, %61 : vector<2x256xf32>
    %63 = arith.mulf %62, %55 : vector<2x256xf32>
    %64 = arith.subf %59, %63 : vector<2x256xf32>
    %65 = math.absf %64 : vector<2x256xf32>
    %66 = vector.shape_cast %65 : vector<2x256xf32> to vector<1x2x256xf32>
    %cst_35 = arith.constant dense<0xFF800000> : vector<1xf32>
    %67 = vector.multi_reduction <maximumf>, %66, %cst_35 [1, 2] : vector<1x2x256xf32> to vector<1xf32>
    %68 = vector.shape_cast %67 : vector<1xf32> to vector<1x1x1xf32>
    %69 = vector.extract %68[0, 0, 0] : f32 from vector<1x1x1xf32>
    %cst_36 = arith.constant 1.000000e-01 : f32
    %70 = arith.mulf %cst_36, %69 : f32
    %71 = vector.broadcast %70 : f32 to vector<2x256xf32>
    %72 = arith.cmpf ogt, %65, %71 : vector<2x256xf32>
    %cst_37 = arith.constant 1.000000e+00 : f32
    %cst_38 = arith.constant 0.000000e+00 : f32
    %73 = vector.broadcast %cst_37 : f32 to vector<2x256xf32>
    %74 = vector.broadcast %cst_38 : f32 to vector<2x256xf32>
    %75 = arith.select %72, %73, %74 : vector<2x256xi1>, vector<2x256xf32>
    %76 = vector.shape_cast %75 : vector<2x256xf32> to vector<1x2x256xf32>
    %cst_39 = arith.constant dense<0.000000e+00> : vector<1xf32>
    %77 = vector.multi_reduction <add>, %76, %cst_39 [1, 2] : vector<1x2x256xf32> to vector<1xf32>
    %78 = vector.shape_cast %77 : vector<1xf32> to vector<1x1x1xf32>
    %79 = vector.extract %78[0, 0, 0] : f32 from vector<1x1x1xf32>
    %80 = arith.mulf %75, %65 : vector<2x256xf32>
    %81 = arith.mulf %80, %24 : vector<2x256xf32>
    %82 = vector.shape_cast %81 : vector<2x256xf32> to vector<1x2x256xf32>
    %cst_40 = arith.constant dense<0.000000e+00> : vector<1xf32>
    %83 = vector.multi_reduction <add>, %82, %cst_40 [1, 2] : vector<1x2x256xf32> to vector<1xf32>
    %84 = vector.shape_cast %83 : vector<1xf32> to vector<1x1x1xf32>
    %85 = vector.extract %84[0, 0, 0] : f32 from vector<1x1x1xf32>
    %86 = vector.shape_cast %24 : vector<2x256xf32> to vector<1x2x256xf32>
    %cst_41 = arith.constant dense<0.000000e+00> : vector<1xf32>
    %87 = vector.multi_reduction <add>, %86, %cst_41 [1, 2] : vector<1x2x256xf32> to vector<1xf32>
    %88 = vector.shape_cast %87 : vector<1xf32> to vector<1x1x1xf32>
    %89 = vector.extract %88[0, 0, 0] : f32 from vector<1x1x1xf32>
    %cst_42 = arith.constant 0.001953125 : f32
    %90 = arith.mulf %89, %cst_42 : f32
    %cst_43 = arith.constant 1.000000e+00 : f32
    %91 = arith.maximumf %79, %cst_43 : f32
    %cst_44 = arith.constant 5.000000e-01 : f32
    %92 = arith.mulf %cst_44, %90 : f32
    %93 = arith.divf %85, %91 : f32
    %cst_45 = arith.constant 5.000000e-01 : f32
    %94 = arith.mulf %cst_45, %93 : f32
    %95 = arith.addf %92, %94 : f32
    %96 = vector.broadcast %95 : f32 to vector<1x1xf32>
    %c0_46 = arith.constant 0 : index
    %c0_47 = arith.constant 0 : index
    %97 = vector.load %arg3[%c0_46, %c0_47] : memref<1x1xf32, #tpu.memory_space<vmem>>, vector<1x1xf32>
    tpu.vector_store %arg3[%c0_46, %c0_47], %96 {strides = array<i32>} : memref<1x1xf32, #tpu.memory_space<vmem>>, vector<1x1xf32>,
    return
  }
}

</mosaic_0001>

<bundles_post_ra>
// kernel: tpu_custom_call.1
= control target key start
LH: loop header
LB: loop body
LE: loop exit
PB: predicated region body
PF: predicated region fallthrough
CT: control target
= control target key end

     0   :  { %8 = vsyncpa [#allocation5], 0  ;;  %s938_s0 = inlined_call_operand.hbm [shape: bf16[256,256], index: 0, kind: input, shape index: {}]   ;;  %s939_s1 = inlined_call_operand.hbm [shape: f32[2,256], index: 1, kind: input, shape index: {}]   ;;  %s940_s2 = inlined_call_operand.hbm [shape: f32[2,256], index: 2, kind: input, shape index: {}]   ;;  %s941_s3 = inlined_call_operand.hbm [shape: f32[1,1], index: 3, kind: output, shape index: {}]  }
   0x1   :  { %9 = vsyncpa [#allocation8], 0 }
   0x2   :  { %10 = vsyncpa [#allocation6], 0  ;;  %s834_s12 = smov [#allocation7]   ;;  %s835_s14 = smov [#allocation4]  }
   0x3   :  { %s29_s13 = sshll.u32 %s834_s12, 4  ;;  %s16_s15 = sshll.u32 %s835_s14, 4  ;;  %s30_s13 = int_to_ptr.vmem [resolvable:$true] %s29_s13  ;;  %s17_s15 = int_to_ptr.vmem [resolvable:$true] %s16_s15 }
   0x4   :  { %s756_s16 = scalar_lea.vmem %s30_s13, 64  ;;  %p761_p1 = scmp.lt.s32.totalorder %s30_s13, %s30_s13 }
   0x5   :  { %p757_p0 = scmp.ne.s32.totalorder %s30_s13, %s756_s16  ;;  %p762_p2 = scmp.lt.s32.totalorder %s756_s16, %s756_s16 }
   0x7   :  { %p763_p3 = por %p762_p2, %p761_p1 }
   0x9   :  { %p764_p4 = pnand %p763_p3, %p757_p0 }
   0xb   :  { %767 = shalt.err (!%p764_p4)
}
   0xc   :  { %32 = dma.hbm_to_vmem [thread:$0]  %s939_s1, 64, %s30_s13, [#allocation8]  }
   0xd   :  { %s776_s19 = scalar_lea.vmem %s17_s15, 4096  ;;  %p781_p6 = scmp.lt.s32.totalorder %s17_s15, %s17_s15 }
   0xe   :  { %p777_p5 = scmp.ne.s32.totalorder %s17_s15, %s776_s19  ;;  %p782_p7 = scmp.lt.s32.totalorder %s776_s19, %s776_s19 }
  0x10   :  { %p783_p8 = por %p782_p7, %p781_p6 }
  0x12   :  { %p784_p9 = pnand %p783_p8, %p777_p5 }
  0x14   :  { %787 = shalt.err (!%p784_p9)
}
  0x15   :  { %s836_s20 = smov 128   ;;  %s837_s21 = smov 8  }
  0x16   :  { %22 = dma.hbm_to_vmem [thread:$0]  %s938_s0, 4096, %s17_s15, [#allocation5], %s836_s20, %s836_s20, %s837_s21  }
  0x17   :  { %s838_s24 = smov [#allocation9]  }
  0x18   :  { %s39_s25 = sshll.u32 %s838_s24, 4  ;;  %s40_s25 = int_to_ptr.vmem [resolvable:$true] %s39_s25 }
  0x19   :  { %s796_s26 = scalar_lea.vmem %s40_s25, 64  ;;  %p801_p11 = scmp.lt.s32.totalorder %s40_s25, %s40_s25 }
  0x1a   :  { %p797_p10 = scmp.ne.s32.totalorder %s40_s25, %s796_s26  ;;  %p802_p12 = scmp.lt.s32.totalorder %s796_s26, %s796_s26 }
  0x1c   :  { %p803_p13 = por %p802_p12, %p801_p11 }
  0x1e   :  { %p804_p0 = pnand %p803_p13, %p797_p10 }
  0x20   :  { %807 = shalt.err (!%p804_p0)
}
  0x21   :  { %42 = dma.hbm_to_vmem [thread:$0]  %s940_s2, 64, %s40_s25, [#allocation8]  }
  0x22   :  { %828 = dma.done.wait [#allocation5], 4096  }
  0x23   :  { %829 = vsyncadd [#allocation5], 4294963200 }
  0x24   :  { %830 = dma.done.wait [#allocation8], 128  }
  0x25   :  { %831 = vsyncadd [#allocation8], 4294967168  ;;  %v671_v0 = vld [vmem:[#allocation4 + $0x74] ss:$8 sps:$4 sm:$0xff]   ;;  %v673_v1 = vld [vmem:[#allocation4 + $0x70] ss:$8 sps:$4 sm:$0xff]   ;;  %v76_v11 = vlaneseq }
  0x26   :  { %324 = vmatprep.subr.bf16.mxu0 %v671_v0  ;;  %v674_v2 = vld [vmem:[#allocation4 + $0x64] ss:$8 sps:$4 sm:$0xff]   ;;  %v676_v3 = vld [vmem:[#allocation4 + $0x60] ss:$8 sps:$4 sm:$0xff]   ;;  %v677_v4 = vld [vmem:[#allocation4 + $0x54] ss:$8 sps:$4 sm:$0xff]  }
  0x27   :  { %325 = vmatpush1.bf16.msra.mxu0 %v673_v1  ;;  %v679_v5 = vld [vmem:[#allocation4 + $0x50] ss:$8 sps:$4 sm:$0xff]   ;;  %v680_v6 = vld [vmem:[#allocation4 + $0x44] ss:$8 sps:$4 sm:$0xff]   ;;  %v682_v7 = vld [vmem:[#allocation4 + $0x40] ss:$8 sps:$4 sm:$0xff]  }
  0x28   :  { %326 = vmatprep.subr.bf16.mxu0 %v674_v2  ;;  %v683_v8 = vld [vmem:[#allocation4 + $0x34] ss:$8 sps:$4 sm:$0xff]   ;;  %v839_v9 = vmov 1983009808   ;;  %v685_v12 = vld [vmem:[#allocation4 + $0x30] ss:$8 sps:$4 sm:$0xff]  }
  0x29   :  { %v74_v10 = vunpack.c.l.s4 %v839_v9  ;;  %v686_v13 = vld [vmem:[#allocation4 + $0x24] ss:$8 sps:$4 sm:$0xff]   ;;  %v77_v15 = vshrl.u32 %v76_v11, 7  ;;  %v688_v16 = vld [vmem:[#allocation4 + $0x20] ss:$8 sps:$4 sm:$0xff]   ;;  %vm500_vm8 = vcmask 1041408  }
  0x2a   :  { %v689_v17 = vld [vmem:[#allocation4 + $0x14] ss:$8 sps:$4 sm:$0xff]   ;;  %v874_v19 = vld [vmem:[#allocation7] sm:$0xf]  ;;  %v876_v20 = vld [vmem:[#allocation9] sm:$0xf] }
  0x2b   :  { %327 = vmatpush1.bf16.msra.mxu0 %v676_v3  ;;  %v75_v14 = vunpack.c.0.s8 %v74_v10  ;;  %v54_v21 = vsub.f32 0.0, %v874_v19  ;;  %v86_v22 = vcombine.low %v876_v20, %v876_v20  ;;  %v113_v23 = vmul.f32 %v876_v20, %v876_v20  ;;  %v691_v24 = vld [vmem:[#allocation4 + $0x10] ss:$8 sps:$4 sm:$0xff]   ;;  %v692_v25 = vld [vmem:[#allocation4 + $0x4] ss:$8 sps:$4 sm:$0xff]   ;;  %s841_s29 = smov 1.0  }
  0x2c   :  { %328 = vmatprep.subr.bf16.mxu0 %v677_v4  ;;  %v694_v31 = vld [vmem:[#allocation4] ss:$8 sps:$4 sm:$0xff]   ;;  %v695_v32 = vld [vmem:[#allocation4 + $0xf4] ss:$8 sps:$4 sm:$0xff]   ;;  %v697_v34 = vld [vmem:[#allocation4 + $0xf0] ss:$8 sps:$4 sm:$0xff]  }
  0x2d   :  { %v872_v18 = vsub.s32 %v75_v14, %v77_v15  ;;  %v55_v26 = vmul.f32 1.442695, %v54_v21  ;;  %v115_v28 = vcombine.low %v113_v23, %v113_v23  ;;  %617 = vst.sshfl [vmem:[#allocation2] sm:$0x30 pattern:$0x76325410] %v86_v22 }
  0x2e   :  { %v698_v35 = vld [vmem:[#allocation4 + $0xe4] ss:$8 sps:$4 sm:$0xff]   ;;  %v700_v36 = vld [vmem:[#allocation4 + $0xe0] ss:$8 sps:$4 sm:$0xff]   ;;  %v701_v37 = vld [vmem:[#allocation4 + $0xd4] ss:$8 sps:$4 sm:$0xff]  }
  0x2f   :  { %329 = vmatpush1.bf16.msra.mxu0 %v679_v5  ;;  %v93_v27 = vrot.slane %v86_v22, %v872_v18  ;;  %722 = vpow2.f32 %v55_v26  ;;  %v122_v30 = vrot.slane %v115_v28, %v872_v18  ;;  %619 = vst.sshfl [vmem:[#allocation2 + $0x8] sm:$0xc0 pattern:$0x76325410] %v115_v28  ;;  %v703_v39 = vld [vmem:[#allocation4 + $0xd0] ss:$8 sps:$4 sm:$0xff]  }
  0x30   :  { %330 = vmatprep.subr.bf16.mxu0 %v680_v6  ;;  %v704_v40 = vld [vmem:[#allocation4 + $0xc4] ss:$8 sps:$4 sm:$0xff]   ;;  %v706_v42 = vld [vmem:[#allocation4 + $0xc0] ss:$8 sps:$4 sm:$0xff]   ;;  %v707_v43 = vld [vmem:[#allocation4 + $0xb4] ss:$8 sps:$4 sm:$0xff]  }
  0x31   :  { %v94_v29 = vcombine.high %v93_v27, %v93_v27  ;;  %v123_v33 = vcombine.low %v122_v30, %v122_v30  ;;  %v709_v44 = vld [vmem:[#allocation4 + $0xb0] ss:$8 sps:$4 sm:$0xff]   ;;  %v710_v45 = vld [vmem:[#allocation4 + $0xa4] ss:$8 sps:$4 sm:$0xff]   ;;  %v712_v46 = vld [vmem:[#allocation4 + $0xa0] ss:$8 sps:$4 sm:$0xff]  }
  0x32   :  { %v713_v47 = vld [vmem:[#allocation4 + $0x94] ss:$8 sps:$4 sm:$0xff]   ;;  %v715_v49 = vld [vmem:[#allocation4 + $0x90] ss:$8 sps:$4 sm:$0xff]   ;;  %v716_v50 = vld [vmem:[#allocation4 + $0x84] ss:$8 sps:$4 sm:$0xff]  }
  0x33   :  { %331 = vmatpush1.bf16.msra.mxu0 %v682_v7  ;;  %98 = vst [vmem:[#allocation2 + $0x8] sm:$0xc] %v94_v29  ;;  %126 = vst [vmem:[#allocation2] sm:$0xc0] %v123_v33  ;;  %v718_v54 = vld [vmem:[#allocation4 + $0x80] ss:$8 sps:$4 sm:$0xff]  }
  0x34   :  { %332 = vmatprep.subr.bf16.mxu0 %v683_v8  ;;  %s842_s11 = smov [#allocation10]   ;;  %vm598_vm10 = vcmask 0  }
  0x35   :  { %s606_s12 = sshll.u32 %s842_s11, 4  ;;  %s607_s12 = int_to_ptr.vmem [resolvable:$true] %s606_s12 }
  0x36   :  { %s808_s14 = scalar_lea.vmem %s607_s12, 16  ;;  %s812_s15 = scalar_lea.vmem %s607_s12, 32 }
  0x37   :  { %333 = vmatpush1.bf16.msra.mxu0 %v685_v12  ;;  %p809_p1 = scmp.ne.s32.totalorder %s607_s12, %s808_s14  ;;  %p813_p2 = scmp.lt.s32.totalorder %s607_s12, %s607_s12 }
  0x38   :  { %334 = vmatprep.subr.bf16.mxu0 %v686_v13  ;;  %p814_p3 = scmp.lt.s32.totalorder %s812_s15, %s808_s14 }
  0x3a   :  { %p815_p4 = por %p814_p3, %p813_p2 }
  0x3b   :  { %335 = vmatpush1.bf16.msra.mxu0 %v688_v16 }
  0x3c   :  { %336 = vmatprep.subr.bf16.mxu0 %v689_v17  ;;  %v723_v38 = vpop.eup %722  ;;  %p816_p5 = pnand %p815_p4, %p809_p1 }
  0x3d   :  { %v57_v41 = vadd.f32 1.0, %v723_v38 }
  0x3f   :  { %337 = vmatpush1.bf16.msra.mxu0 %v691_v24  ;;  %724 = vrcp.f32 %v57_v41 }
  0x40   :  { %338 = vmatprep.subr.bf16.mxu0 %v692_v25 }
  0x43   :  { %339 = vmatpush1.bf16.msra.mxu0 %v694_v31 }
  0x44   :  { %340 = vmatprep.subr.bf16.mxu0 %v695_v32 }
  0x47   :  { %341 = vmatpush2.bf16.msra.mxu0 %v697_v34 }
  0x48   :  { %342 = vmatprep.subr.bf16.mxu0 %v698_v35 }
  0x4b   :  { %343 = vmatpush2.bf16.msra.mxu0 %v700_v36 }
  0x4c   :  { %344 = vmatprep.subr.bf16.mxu0 %v701_v37  ;;  %v725_v48 = vpop.eup %724 }
  0x4d   :  { %v887_v51 = vadd.f32 1e-06, %v725_v48 }
  0x4f   :  { %345 = vmatpush2.bf16.msra.mxu0 %v703_v39  ;;  %v79_v52 = vrot.slane %v887_v51, %v872_v18  ;;  %v99_v53 = vmul.f32 %v887_v51, %v887_v51  ;;  %616 = vst.sshfl [vmem:[#allocation2] sm:$0x3 pattern:$0x76325410] %v887_v51 }
  0x50   :  { %346 = vmatprep.subr.bf16.mxu0 %v704_v40 }
  0x51   :  { %v80_v55 = vcombine.high %v79_v52, %v79_v52  ;;  %v107_v56 = vrot.slane %v99_v53, %v872_v18  ;;  %618 = vst.sshfl [vmem:[#allocation2 + $0x8] sm:$0xc pattern:$0x76325410] %v99_v53 }
  0x53   :  { %347 = vmatpush2.bf16.msra.mxu0 %v706_v42  ;;  %84 = vst [vmem:[#allocation2 + $0x8] sm:$0x3] %v80_v55  ;;  %v108_v57 = vcombine.low %v107_v56, %v107_v56 }
  0x54   :  { %348 = vmatprep.subr.bf16.mxu0 %v707_v43 }
  0x55   :  { %111 = vst [vmem:[#allocation2] sm:$0x30] %v108_v57 }
  0x57   :  { %349 = vmatpush2.bf16.msra.mxu0 %v709_v44 }
  0x58   :  { %350 = vmatprep.subr.bf16.mxu0 %v710_v45 }
  0x5a   :  { %v129_v58 = vld [vmem:[#allocation2 + $0x8] sm:$0xff] }
  0x5b   :  { %351 = vmatpush2.bf16.msra.mxu0 %v712_v46  ;;  %v131_v59 = vpack.c.bf16 %v129_v58, %v129_v58 }
  0x5c   :  { %352 = vmatprep.subr.bf16.mxu0 %v713_v47  ;;  %v128_v60 = vld [vmem:[#allocation2] sm:$0xff] }
  0x5d   :  { %356 = vmatprep.mubr.bf16.mxu0 %v131_v59  ;;  %v130_v61 = vpack.c.bf16 %v128_v60, %v128_v60 }
  0x5f   :  { %353 = vmatpush2.bf16.msra.mxu0 %v715_v49 }
  0x60   :  { %354 = vmatprep.subr.bf16.mxu0 %v716_v50 }
  0x63   :  { %355 = vmatpush2.bf16.msra.mxu0 %v718_v54 }
  0x66   :  { %357 = vmatmul.mubr.bf16.vlgmr.msra.gmra.mxu0 %v130_v61 }
 0x126   :  { %v358_v62 = vpop.f32.mrf.mxu0 }
 0x127   :  { %365 = vst [vmem:[#allocation3] sm:$0xff] %v358_v62 }
 0x128   :  { %v360_v63 = vpop.f32.mrf.mxu0 }
 0x129   :  { %366 = vst [vmem:[#allocation3 + $0x8] sm:$0xff] %v360_v63 }
 0x12a   :  { %v362_v0 = vpop.f32.mrf.mxu0 }
 0x12c   :  { %v363_v1 = vpop.f32.mrf.mxu0 }
 0x12e   :  { %v895_v2 = vld [vmem:[#allocation3] sm:$0x3]  ;;  %v897_v3 = vld [vmem:[#allocation3] sm:$0xc]  ;;  %v371_v12 = vld [vmem:[#allocation3] sm:$0x30] }
 0x12f   :  { %v373_v4 = vmul.f32 %v895_v2, %v895_v2  ;;  %v385_v5 = vmul.f32 %v897_v3, %v897_v3  ;;  %v383_v13 = vld [vmem:[#allocation3] sm:$0xc0] }
 0x130   :  { %v903_v6 = vld [vmem:[#allocation3 + $0x8] sm:$0x3]  ;;  %v370_v7 = vld [vmem:[#allocation3 + $0x8] sm:$0xc]  ;;  %v372_v22 = vld [vmem:[#allocation3 + $0x8] sm:$0x30] }
 0x131   :  { %v374_v8 = vmul.f32 %v903_v6, %v903_v6  ;;  %v377_v9 = vrot.slane %v373_v4, 4  ;;  %v386_v10 = vmul.f32 %v370_v7, %v370_v7  ;;  %v389_v11 = vrot.slane %v385_v5, 4  ;;  %v384_v23 = vld [vmem:[#allocation3 + $0x8] sm:$0xc0] }
 0x132   :  { %v462_v55 = vcombine.low %v897_v3, %v370_v7  ;;  %v437_v56 = vcombine.low %v895_v2, %v903_v6 }
 0x133   :  { %v378_v14 = vrot.slane %v374_v8, 4  ;;  %v381_v15 = vsub.f32 %v371_v12, %v377_v9  ;;  %v390_v16 = vrot.slane %v386_v10, 4  ;;  %v393_v17 = vsub.f32 %v383_v13, %v389_v11 }
 0x134   :  { %v469_v57 = vrot.slane %v462_v55, %v872_v18  ;;  %v444_v59 = vrot.slane %v437_v56, %v872_v18 }
 0x135   :  { %v382_v24 = vsub.f32 %v372_v22, %v378_v14  ;;  %v394_v25 = vsub.f32 %v384_v23, %v390_v16  ;;  %v395_v26 = vadd.f32 0.01, %v381_v15  ;;  %v415_v27 = vadd.f32 0.01, %v393_v17 }
 0x136   :  { %v470_v60 = vcombine.high %v469_v57, %v469_v57  ;;  %v446_v1 = vsub.f32 %v876_v20, %v444_v59 }
 0x137   :  { %v396_v28 = vadd.f32 0.01, %v382_v24  ;;  %726 = vrsqrt.f32 %v395_v26  ;;  %v416_v29 = vadd.f32 0.01, %v394_v25  ;;  %vm399_vm0 = vcmp.eq.f32.partialorder %v395_v26, inf }
 0x138   :  { %728 = vrsqrt.f32 %v415_v27  ;;  %vm401_vm1 = vcmp.eq.f32.partialorder %v395_v26, 0.0  ;;  %v402_v33 = vand.u32 2147483648, %v395_v26  ;;  %vm419_vm2 = vcmp.eq.f32.partialorder %v415_v27, inf }
 0x139   :  { %730 = vrsqrt.f32 %v396_v28  ;;  %vm406_vm3 = vcmp.eq.f32.partialorder %v396_v28, inf  ;;  %vm408_vm4 = vcmp.eq.f32.partialorder %v396_v28, 0.0  ;;  %v409_v35 = vand.u32 2147483648, %v396_v28 }
 0x13a   :  { %732 = vrsqrt.f32 %v416_v29  ;;  %vm421_vm5 = vcmp.eq.f32.partialorder %v415_v27, 0.0  ;;  %v422_v40 = vand.u32 2147483648, %v415_v27  ;;  %vm426_vm6 = vcmp.eq.f32.partialorder %v416_v29, inf }
 0x13b   :  { %v429_v47 = vand.u32 2147483648, %v416_v29  ;;  %vm428_vm7 = vcmp.eq.f32.partialorder %v416_v29, 0.0  ;;  %v472_v4 = vsub.f32 %v887_v51, %v470_v60  ;;  %v447_v2 = vadd.f32 0.01, %v446_v1 }
 0x13d   :  { %v473_v6 = vadd.f32 0.01, %v472_v4 }
 0x144   :  { %v727_v30 = vpop.eup %726 }
 0x145   :  { %v729_v31 = vpop.eup %728  ;;  %v398_v32 = vmul.f32 %v727_v30, %v395_v26 }
 0x146   :  { %v731_v34 = vpop.eup %730  ;;  %v418_v36 = vmul.f32 %v729_v31, %v415_v27 }
 0x147   :  { %v733_v37 = vpop.eup %732  ;;  %v400_v38 = vsel %vm399_vm0, %v395_v26, %v398_v32  ;;  %v405_v39 = vmul.f32 %v731_v34, %v396_v28 }
 0x148   :  { %v403_v41 = vsel %vm401_vm1, %v402_v33, %v400_v38  ;;  %v420_v42 = vsel %vm419_vm2, %v415_v27, %v418_v36  ;;  %v425_v43 = vmul.f32 %v733_v37, %v416_v29  ;;  %v60_v33 = vmul.f32 %v876_v20, %v874_v19 }
 0x149   :  { %v407_v44 = vsel %vm406_vm3, %v396_v28, %v405_v39  ;;  %v411_v45 = vadd.f32 0.01, %v403_v41  ;;  %v423_v46 = vsel %vm421_vm5, %v422_v40, %v420_v42  ;;  %v64_v28 = vand.u32 2147483647, %v874_v19 }
 0x14a   :  { %v410_v48 = vsel %vm408_vm4, %v409_v35, %v407_v44  ;;  %v427_v49 = vsel %vm426_vm6, %v416_v29, %v425_v43  ;;  %v431_v50 = vadd.f32 0.01, %v423_v46  ;;  %v61_v34 = vsub.f32 %v874_v19, %v60_v33 }
 0x14b   :  { %v412_v52 = vadd.f32 0.01, %v410_v48  ;;  %734 = vrcp.f32 %v411_v45  ;;  %v430_v53 = vsel %vm428_vm7, %v429_v47, %v427_v49  ;;  %v65_v29 = vsub.f32 0.0, %v64_v28 }
 0x14c   :  { %v432_v54 = vadd.f32 0.01, %v430_v53  ;;  %736 = vrcp.f32 %v431_v50  ;;  %v62_v35 = vmax.f32 %v54_v21, 0.0  ;;  %v840_v41 = vmov 0.0  }
 0x14d   :  { %738 = vrcp.f32 %v412_v52  ;;  %v66_v30 = vmul.f32 1.442695, %v65_v29 }
 0x14e   :  { %740 = vrcp.f32 %v432_v54  ;;  %v63_v37 = vadd.f32 %v62_v35, %v61_v34 }
 0x14f   :  { %742 = vpow2.f32 %v66_v30 }
 0x158   :  { %v735_v58 = vpop.eup %734 }
 0x159   :  { %v737_v61 = vpop.eup %736 }
 0x15a   :  { %v739_v62 = vpop.eup %738 }
 0x15b   :  { %v741_v63 = vpop.eup %740  ;;  %v450_v0 = vcombine.high %v735_v58, %v739_v62 }
 0x15c   :  { %v476_v5 = vcombine.high %v737_v61, %v741_v63  ;;  %v743_v31 = vpop.eup %742 }
 0x15d   :  { %v457_v3 = vrot.slane %v450_v0, %v872_v18  ;;  %v68_v32 = vadd.f32 1.0, %v743_v31 }
 0x15e   :  { %v483_v7 = vrot.slane %v476_v5, %v872_v18 }
 0x15f   :  { %v459_v9 = vmul.f32 %v457_v3, %v447_v2  ;;  %744 = vlog2.f32 %v68_v32 }
 0x160   :  { %v484_v8 = vcombine.high %v483_v7, %v483_v7 }
 0x162   :  { %v486_v10 = vmul.f32 %v484_v8, %v473_v6 }
 0x164   :  { %v487_v11 = vsub.f32 %v459_v9, %v486_v10 }
 0x166   :  { %v488_v12 = vand.u32 2147483647, %v487_v11 }
 0x168   :  { %v496_v13 = vrot.slane %v488_v12, %v872_v18 }
 0x16a   :  { %v497_v14 = vcombine.high %v496_v13, %v496_v13  ;;  %v501_v15 = vsel %vm500_vm8, %v496_v13, -inf }
 0x16c   :  { %v502_v51 = vsel %vm500_vm8, %v497_v14, -inf  ;;  %v745_v36 = vpop.eup %744 }
 0x16d   :  { %v503_v16 = vmax.f32 %v501_v15, %v502_v51  ;;  %v70_v38 = vmul.f32 0.6931472, %v745_v36 }
 0x16f   :  { %504 = vmax.xlane.f32.xlu0 %v503_v16  ;;  %v71_v40 = vadd.f32 %v70_v38, %v63_v37 }
 0x171   :  { %v572_v20 = vrot.slane %v71_v40, %v872_v18 }
 0x173   :  { %v573_v48 = vcombine.high %v572_v20, %v572_v20  ;;  %v576_v54 = vsel %vm500_vm8, %v572_v20, 0.0 }
 0x175   :  { %v577_v55 = vsel %vm500_vm8, %v573_v48, 0.0 }
 0x176   :  { %v578_v57 = vadd.f32 %v577_v55, %v576_v54 }
 0x1f8   :  { %v505_v17 = vpop.xlane.xlu0 %504 }
 0x1f9   :  { %v506_v22 = vrot.slane %v505_v17, 4 }
 0x1fb   :  { %v507_v23 = vmax.f32 %v505_v17, %v506_v22 }
 0x1fd   :  { %v508_v24 = vrot.slane %v507_v23, 2 }
 0x1ff   :  { %v509_v25 = vmax.f32 %v507_v23, %v508_v24 }
 0x201   :  { %v510_v26 = vrot.slane %v509_v25, 1 }
 0x203   :  { %v511_v27 = vmax.f32 %v509_v25, %v510_v26 }
 0x205   :  { %652 = vpush %v511_v27 }
 0x236   :  { %s653_s0 = spop %652 }
 0x237   :  { %s513_s2 = smul.f32 0.1, %s653_s0 }
 0x239   :  { %v514_v39 = vstv %s513_s2 }
 0x23a   :  { %vm515_vm9 = vcmp.gt.f32.partialorder %v488_v12, %v514_v39 }
 0x23b   :  { %v516_v42 = vsel %vm515_vm9, 1.0, %v840_v41 }
 0x23c   :  { %v524_v43 = vrot.slane %v516_v42, %v872_v18  ;;  %v540_v44 = vmul.f32 %v516_v42, %v488_v12 }
 0x23e   :  { %v525_v45 = vcombine.high %v524_v43, %v524_v43  ;;  %v541_v46 = vmul.f32 %v540_v44, %v71_v40  ;;  %v528_v19 = vsel %vm500_vm8, %v524_v43, 0.0 }
 0x240   :  { %v529_v21 = vsel %vm500_vm8, %v525_v45, 0.0  ;;  %v549_v47 = vrot.slane %v541_v46, %v872_v18 }
 0x241   :  { %v530_v49 = vadd.f32 %v529_v21, %v528_v19 }
 0x242   :  { %v550_v50 = vcombine.high %v549_v47, %v549_v47  ;;  %v553_v52 = vsel %vm500_vm8, %v549_v47, 0.0 }
 0x243   :  { %531 = vadd.xlane.f32.xlu0 %v530_v49 }
 0x244   :  { %v554_v53 = vsel %vm500_vm8, %v550_v50, 0.0 }
 0x245   :  { %v555_v56 = vadd.f32 %v554_v53, %v553_v52 }
 0x247   :  { %556 = vadd.xlane.f32.xlu1 %v555_v56 }
 0x24b   :  { %579 = vadd.xlane.f32.xlu1 %v578_v57 }
 0x2cc   :  { %v532_v58 = vpop.xlane.xlu0 %531 }
 0x2cd   :  { %v533_v59 = vrot.slane %v532_v58, 4 }
 0x2cf   :  { %v534_v60 = vadd.f32 %v533_v59, %v532_v58 }
 0x2d0   :  { %v557_v18 = vpop.xlane.xlu1 %556 }
 0x2d1   :  { %v535_v61 = vrot.slane %v534_v60, 2  ;;  %v558_v62 = vrot.slane %v557_v18, 4 }
 0x2d3   :  { %v536_v63 = vadd.f32 %v535_v61, %v534_v60  ;;  %v559_v0 = vadd.f32 %v558_v62, %v557_v18 }
 0x2d4   :  { %v580_v1 = vpop.xlane.xlu1 %579 }
 0x2d5   :  { %v560_v4 = vrot.slane %v559_v0, 2  ;;  %v537_v5 = vrot.slane %v536_v63, 1  ;;  %v581_v3 = vrot.slane %v580_v1, 4 }
 0x2d7   :  { %v538_v7 = vadd.f32 %v537_v5, %v536_v63  ;;  %v561_v2 = vadd.f32 %v560_v4, %v559_v0  ;;  %v582_v6 = vadd.f32 %v581_v3, %v580_v1 }
 0x2d9   :  { %654 = vpush %v538_v7  ;;  %v562_v8 = vrot.slane %v561_v2, 1  ;;  %v583_v9 = vrot.slane %v582_v6, 2 }
 0x2db   :  { %v563_v10 = vadd.f32 %v562_v8, %v561_v2  ;;  %v584_v11 = vadd.f32 %v583_v9, %v582_v6 }
 0x2dd   :  { %656 = vpush %v563_v10  ;;  %v585_v12 = vrot.slane %v584_v11, 1 }
 0x2df   :  { %v586_v13 = vadd.f32 %v585_v12, %v584_v11 }
 0x2e1   :  { %658 = vpush %v586_v13 }
 0x30a   :  { %s655_s28 = spop %654 }
 0x30b   :  { %s589_s30 = smax.f32 %s841_s29, %s655_s28 }
 0x30c   :  { %v591_v14 = vstv %s589_s30 }
 0x30d   :  { %746 = vrcp.f32 %v591_v14 }
 0x30e   :  { %s657_s4 = spop %656 }
 0x312   :  { %s659_s5 = spop %658 }
 0x313   :  { %s588_s6 = smul.f32 0.001953125, %s659_s5 }
 0x315   :  { %s590_s9 = smul.f32 0.5, %s588_s6 }
 0x31a   :  { %v747_v15 = vpop.eup %746 }
 0x31b   :  { %660 = vpush %v747_v15 }
 0x34c   :  { %s661_s7 = spop %660 }
 0x34d   :  { %s594_s8 = smul.f32 %s661_s7, %s657_s4 }
 0x34f   :  { %s595_s10 = smul.f32 0.5, %s594_s8 }
 0x351   :  { %s596_s13 = sadd.f32 %s595_s10, %s590_s9 }
 0x353   :  { %v597_v51 = vstv %s596_s13 }
 0x354   :  { %599 = vst.msk [vmem:[#allocation10] sm:$0x1] %vm598_vm10, %v597_v51 }
 0x355   :  { %819 = shalt.err (!%p816_p5)
}
 0x356   :  { %609 = dma.vmem_to_hbm [thread:$0]  %s607_s12, 16, %s941_s3, [#allocation6]  }
 0x357   :  { %832 = dma.done.wait [#allocation6], 16  }
 0x358   :  { %833 = vsyncadd [#allocation6], 4294967280 }
 0x359   :  { %613 = vsyncpa [#allocation5], 1 }
 0x35a   :  { %614 = vsyncpa [#allocation8], 1 }
 0x35b   :  { %615 = vsyncpa [#allocation6], 1 }

</bundles_post_ra>
